<compile_context>
chip_gen: v7x
topology: tpu7x:2x2x1
jax: 0.10.0
libtpu: 0.0.40
codegen_flags: <defaults>
</compile_context>

<pallas_src>
import jax
import jax.numpy as jnp
from jax.experimental import pallas as pl
from jax.experimental.pallas import tpu as pltpu

IN_FEATURES = 1000   # resnet18 fc.out_features
OUT_FEATURES = 512   # bottleneck width
K_PAD = 1024         # 1000 -> 1024 zero pad (applied once to the weight)


def _bottleneck_kernel(x_ref, w_ref, b_ref, o_ref, x_vmem):
    """Single step: zero-pad LHS into VMEM, one aligned bf16 MXU dot, fused
    bias + ReLU epilogue in f32. Dropout(p=0.2) is identity in eval mode."""
    batch = x_ref.shape[0]

    # Zero-fill the (m_pad, K_PAD) f32 staging buffer so the K/M padding
    # contributes exactly 0 to the contraction (fresh VMEM may hold garbage).
    x_vmem[...] = jnp.zeros_like(x_vmem)
    # Place the unpadded f32 activations in the top-left corner (static slice,
    # 32-bit masked store; no sub-32-bit masking involved).
    x_vmem[0:batch, 0:IN_FEATURES] = x_ref[...]

    # Fully (8,128)-aligned bf16 x bf16 -> f32 MXU matmul.
    lhs = x_vmem[...].astype(jnp.bfloat16)
    acc = jnp.dot(lhs, w_ref[...], preferred_element_type=jnp.float32)

    # Bias + ReLU fused epilogue in f32.
    o_ref[...] = jnp.maximum(acc + b_ref[...], 0.0).astype(o_ref.dtype)


@jax.jit
def feature_net_forward(x, w_pad_bf16, b):
    """x: (B, 1000) f32 (stand-in for model_ft(x));
    w_pad_bf16: (1024, 512) bf16 (= zero-padded weight.T); b: (512,) f32."""
    batch = x.shape[0]
    # bf16 packs 16 rows per vreg -> pad the staged batch dim to 16.
    m_pad = max(16, -(-batch // 16) * 16)
    b2d = b.reshape(1, OUT_FEATURES)

    flops = 2 * m_pad * K_PAD * OUT_FEATURES
    bytes_accessed = (
        K_PAD * OUT_FEATURES * 2            # bf16 weight (dominant stream)
        + batch * IN_FEATURES * 4           # f32 activations
        + OUT_FEATURES * 4                  # f32 bias
        + m_pad * OUT_FEATURES * 4          # f32 output
    )

    out_pad = pl.pallas_call(
        _bottleneck_kernel,
        out_shape=jax.ShapeDtypeStruct((m_pad, OUT_FEATURES), jnp.float32),
        grid_spec=pltpu.PrefetchScalarGridSpec(
            num_scalar_prefetch=0,
            grid=(1,),                                               # single step
            in_specs=[
                pl.BlockSpec((batch, IN_FEATURES), lambda i: (0, 0)),    # x (full, unpadded)
                pl.BlockSpec((K_PAD, OUT_FEATURES), lambda i: (0, 0)),   # weight (resident)
                pl.BlockSpec((1, OUT_FEATURES), lambda i: (0, 0)),       # bias (resident)
            ],
            out_specs=pl.BlockSpec((m_pad, OUT_FEATURES), lambda i: (0, 0)),
            scratch_shapes=[pltpu.VMEM((m_pad, K_PAD), jnp.float32)],    # LHS staging
        ),
        cost_estimate=pl.CostEstimate(
            flops=flops, transcendentals=0, bytes_accessed=bytes_accessed
        ),
    )(x, w_pad_bf16, b2d)

    # Padded rows hold ReLU(bias); slice them off before returning.
    return out_pad[:batch]


def init_params(key):
    """Synthetic init matching nn.Linear(1000, 512); weight pre-transposed,
    pre-padded to K_PAD and pre-cast to bf16 (done once, not per call)."""
    kw, kb = jax.random.split(key)
    bound = 1.0 / jnp.sqrt(IN_FEATURES)
    # PyTorch stores weight as (out, in); keep the transposed copy for the kernel.
    weight = jax.random.uniform(
        kw, (OUT_FEATURES, IN_FEATURES), jnp.float32, -bound, bound
    )
    bias = jax.random.uniform(kb, (OUT_FEATURES,), jnp.float32, -bound, bound)
    w_pad_bf16 = (
        jnp.zeros((K_PAD, OUT_FEATURES), jnp.float32)
        .at[:IN_FEATURES, :]
        .set(weight.T)
        .astype(jnp.bfloat16)
    )
    return w_pad_bf16, bias


if __name__ == "__main__":
    key = jax.random.PRNGKey(0)
    k_x, k_p = jax.random.split(key)

    batch = 2
    # x plays the role of model_ft(x): (batch, 1000) resnet18 fc outputs.
    x = jax.random.normal(k_x, (batch, IN_FEATURES), jnp.float32)
    w_pad_bf16, b = init_params(k_p)

    out = feature_net_forward(x, w_pad_bf16, b)
    out = jax.block_until_ready(out)

    # Reference using the same bf16-quantized operands, accumulated in f32.
    x_bf = x.astype(jnp.bfloat16).astype(jnp.float32)
    w_f32 = w_pad_bf16[:IN_FEATURES].astype(jnp.float32)
    ref = jnp.maximum(x_bf @ w_f32 + b, 0.0)

    assert out.shape == (batch, OUT_FEATURES)
    assert jnp.allclose(out, ref, atol=1e-3, rtol=1e-3)

    print("KERNEL_OK")
</pallas_src>

<mosaic_0001>
module attributes {stable_mosaic.version = 11 : i64} {
  func.func @_bottleneck_kernel(%arg0: i32, %arg1: memref<2x1000xf32, #tpu.memory_space<vmem>>, %arg2: memref<1024x512xbf16, #tpu.memory_space<vmem>>, %arg3: memref<1x512xf32, #tpu.memory_space<vmem>>, %arg4: memref<16x512xf32, #tpu.memory_space<vmem>>, %arg5: memref<16x1024xf32, #tpu.memory_space<vmem>>) attributes {dimension_semantics = [#tpu.dimension_semantics<arbitrary>], iteration_bounds = array<i64: 1>, scalar_prefetch = 0 : i64, scratch_operands = 1 : i64, tpu.core_type = #tpu.core_type<tc>, window_params = [{pipeline_mode = #tpu.pipeline_mode<synchronous>, transform_indices = @transform_0, window_bounds = array<i64: 2, 1000>}, {pipeline_mode = #tpu.pipeline_mode<synchronous>, transform_indices = @transform_1, window_bounds = array<i64: 1024, 512>}, {pipeline_mode = #tpu.pipeline_mode<synchronous>, transform_indices = @transform_2, window_bounds = array<i64: 1, 512>}, {pipeline_mode = #tpu.pipeline_mode<synchronous>, transform_indices = @transform_3, window_bounds = array<i64: 16, 512>}]} {
    %cst = arith.constant 0.000000e+00 : f32
    %0 = vector.broadcast %cst : f32 to vector<16x1024xf32>
    %c0 = arith.constant 0 : index
    %c0_0 = arith.constant 0 : index
    %1 = vector.load %arg5[%c0, %c0_0] : memref<16x1024xf32, #tpu.memory_space<vmem>>, vector<16x1024xf32>
    tpu.vector_store %arg5[%c0, %c0_0], %0 {strides = array<i32>} : memref<16x1024xf32, #tpu.memory_space<vmem>>, vector<16x1024xf32>,
    %c0_1 = arith.constant 0 : index
    %c0_2 = arith.constant 0 : index
    %2 = vector.load %arg1[%c0_1, %c0_2] : memref<2x1000xf32, #tpu.memory_space<vmem>>, vector<2x1000xf32>
    %c0_3 = arith.constant 0 : index
    %c0_4 = arith.constant 0 : index
    %3 = vector.load %arg5[%c0_3, %c0_4] : memref<16x1024xf32, #tpu.memory_space<vmem>>, vector<2x1000xf32>
    tpu.vector_store %arg5[%c0_3, %c0_4], %2 {strides = array<i32>} : memref<16x1024xf32, #tpu.memory_space<vmem>>, vector<2x1000xf32>,
    %c0_5 = arith.constant 0 : index
    %c0_6 = arith.constant 0 : index
    %4 = vector.load %arg5[%c0_5, %c0_6] : memref<16x1024xf32, #tpu.memory_space<vmem>>, vector<16x1024xf32>
    %5 = arith.truncf %4 : vector<16x1024xf32> to vector<16x1024xbf16>
    %c0_7 = arith.constant 0 : index
    %c0_8 = arith.constant 0 : index
    %6 = vector.load %arg2[%c0_7, %c0_8] : memref<1024x512xbf16, #tpu.memory_space<vmem>>, vector<1024x512xbf16>
    %cst_9 = arith.constant dense<0.000000e+00> : vector<16x512xf32>
    %7 = tpu.matmul %5, %6, %cst_9 {dimension_numbers = #tpu.dot_dimension_numbers<[1], [0], [0], [1], [0, 0, 1, 1], [], []>} : vector<16x1024xbf16>, vector<1024x512xbf16>, vector<16x512xf32> -> vector<16x512xf32>
    %c0_10 = arith.constant 0 : index
    %c0_11 = arith.constant 0 : index
    %8 = vector.load %arg3[%c0_10, %c0_11] : memref<1x512xf32, #tpu.memory_space<vmem>>, vector<1x512xf32>
    %9 = vector.broadcast %8 : vector<1x512xf32> to vector<16x512xf32>
    %10 = arith.addf %7, %9 : vector<16x512xf32>
    %cst_12 = arith.constant 0.000000e+00 : f32
    %11 = vector.broadcast %cst_12 : f32 to vector<16x512xf32>
    %12 = arith.maximumf %10, %11 : vector<16x512xf32>
    %c0_13 = arith.constant 0 : index
    %c0_14 = arith.constant 0 : index
    %13 = vector.load %arg4[%c0_13, %c0_14] : memref<16x512xf32, #tpu.memory_space<vmem>>, vector<16x512xf32>
    tpu.vector_store %arg4[%c0_13, %c0_14], %12 {strides = array<i32>} : memref<16x512xf32, #tpu.memory_space<vmem>>, vector<16x512xf32>,
    return
  }
  func.func @transform_0(%arg0: i32) -> (i32, i32) {
    %c0_i32 = arith.constant 0 : i32
    %c0_i32_0 = arith.constant 0 : i32
    %c0_i32_1 = arith.constant 0 : i32
    return %c0_i32, %c0_i32_0 : i32, i32
  }
  func.func @transform_1(%arg0: i32) -> (i32, i32) {
    %c0_i32 = arith.constant 0 : i32
    %c0_i32_0 = arith.constant 0 : i32
    %c0_i32_1 = arith.constant 0 : i32
    return %c0_i32, %c0_i32_0 : i32, i32
  }
  func.func @transform_2(%arg0: i32) -> (i32, i32) {
    %c0_i32 = arith.constant 0 : i32
    %c0_i32_0 = arith.constant 0 : i32
    %c0_i32_1 = arith.constant 0 : i32
    return %c0_i32, %c0_i32_0 : i32, i32
  }
  func.func @transform_3(%arg0: i32) -> (i32, i32) {
    %c0_i32 = arith.constant 0 : i32
    %c0_i32_0 = arith.constant 0 : i32
    %c0_i32_1 = arith.constant 0 : i32
    return %c0_i32, %c0_i32_0 : i32, i32
  }
}

</mosaic_0001>

<bundles_post_ra>
// kernel: feature_net_forward.1
= control target key start
LH: loop header
LB: loop body
LE: loop exit
PB: predicated region body
PF: predicated region fallthrough
CT: control target
= control target key end

     0   :  { %8 = vsyncpa [#allocation4], 0  ;;  %s2907_s0 = inlined_call_operand.hbm [shape: f32[2,1000], index: 0, kind: input, shape index: {}]   ;;  %s2908_s1 = inlined_call_operand.hbm [shape: bf16[1024,512], index: 1, kind: input, shape index: {}]   ;;  %s2909_s2 = inlined_call_operand.vmem [shape: f32[1,512], index: 2, kind: input, shape index: {}]   ;;  %s2910_s3 = inlined_call_operand.vmem [shape: f32[16,512], index: 3, kind: output, shape index: {}]  }
   0x1   :  { %9 = vsyncpa [#allocation6], 0  ;;  %s2791_s12 = smov [#allocation3]   ;;  %s2792_s14 = smov [#allocation5]  }
   0x2   :  { %s16_s13 = sshll.u32 %s2791_s12, 4  ;;  %s25_s15 = sshll.u32 %s2792_s14, 4  ;;  %s17_s13 = int_to_ptr.vmem [resolvable:$true] %s16_s13  ;;  %s2817_s15 = int_to_ptr.vmem [resolvable:$true] %s25_s15 }
   0x3   :  { %s2743_s18 = scalar_lea.hbm %s2907_s0, 256 }
   0x4   :  { %p2744_p0 = scmp.ne.s32.totalorder %s2907_s0, %s2743_s18  ;;  %p2747_p1 = scmp.lt.u32.totalorder %s2743_s18, %s2907_s0 }
   0x6   :  { %p2749_p2 = pnand %p2747_p1, %p2744_p0 }
   0x8   :  { %2752 = shalt.err (!%p2749_p2)
}
   0x9   :  { %s2753_s23 = scalar_lea.vmem %s17_s13, 256  ;;  %p2758_p4 = scmp.lt.s32.totalorder %s17_s13, %s17_s13 }
   0xa   :  { %p2754_p3 = scmp.ne.s32.totalorder %s17_s13, %s2753_s23  ;;  %p2759_p5 = scmp.lt.s32.totalorder %s2753_s23, %s2753_s23 }
   0xc   :  { %p2760_p6 = por %p2759_p5, %p2758_p4 }
   0xe   :  { %p2761_p7 = pnand %p2760_p6, %p2754_p3 }
  0x10   :  { %2764 = shalt.err (!%p2761_p7)
}
  0x11   :  { %19 = dma.hbm_to_vmem [thread:$0]  %s2907_s0, 256, %s17_s13, [#allocation4]  }
  0x12   :  { %s2765_s28 = scalar_lea.hbm %s2908_s1, 32768 }
  0x13   :  { %p2766_p8 = scmp.ne.s32.totalorder %s2908_s1, %s2765_s28  ;;  %p2769_p9 = scmp.lt.u32.totalorder %s2765_s28, %s2908_s1 }
  0x15   :  { %p2771_p10 = pnand %p2769_p9, %p2766_p8 }
  0x17   :  { %2774 = shalt.err (!%p2771_p10)
}
  0x18   :  { %s2775_s6 = scalar_lea.vmem %s2817_s15, 32768  ;;  %p2780_p12 = scmp.lt.s32.totalorder %s2817_s15, %s2817_s15 }
  0x19   :  { %p2776_p11 = scmp.ne.s32.totalorder %s2817_s15, %s2775_s6  ;;  %p2781_p13 = scmp.lt.s32.totalorder %s2775_s6, %s2775_s6 }
  0x1b   :  { %p2782_p0 = por %p2781_p13, %p2780_p12 }
  0x1d   :  { %p2783_p1 = pnand %p2782_p0, %p2776_p11 }
  0x1f   :  { %2786 = shalt.err (!%p2783_p1)
}
  0x20   :  { %s2793_s0 = smov 256   ;;  %s2794_s7 = smov 16  }
  0x21   :  { %31 = dma.hbm_to_vmem [thread:$0]  %s2908_s1, 32768, %s2817_s15, [#allocation6], %s2793_s0, %s2793_s0, %s2794_s7  }
  0x22   :  { %2787 = dma.done.wait [#allocation4], 256  }
  0x23   :  { %2788 = vsyncadd [#allocation4], 4294967040 }
  0x24   :  { %2789 = dma.done.wait [#allocation6], 32768  }
  0x25   :  { %2790 = vsyncadd [#allocation6], 4294934528  ;;  %v2795_v0 = vmov 0.0   ;;  %v2357_v1 = vld [vmem:[#allocation5 + $0x4] ss:$16 sps:$4 sm:$0xff]   ;;  %v64_v39 = vlaneseq  ;;  %vm109_vm0 = vcmask 844800  }
  0x26   :  { %41 = vst [vmem:[#allocation2 + $0x8] sm:$0xff] %v2795_v0  ;;  %49 = vst [vmem:[#allocation2 + $0x48] sm:$0xff] %v2795_v0  ;;  %v2359_v2 = vld [vmem:[#allocation5 + $0xc] ss:$16 sps:$4 sm:$0xff]   ;;  %1693 = vmatprep.subr.bf16.mxu0 %v2357_v1  ;;  %v2361_v3 = vld [vmem:[#allocation5] ss:$16 sps:$4 sm:$0xff]  }
  0x27   :  { %40 = vst [vmem:[#allocation2] sm:$0xff] %v2795_v0  ;;  %42 = vst [vmem:[#allocation2 + $0x10] sm:$0xff] %v2795_v0  ;;  %v2362_v4 = vld [vmem:[#allocation5 + $0x8] ss:$16 sps:$4 sm:$0xff]   ;;  %1865 = vmatprep.subr.bf16.mxu1 %v2359_v2  ;;  %v2363_v5 = vld [vmem:[#allocation5 + $0x24] ss:$16 sps:$4 sm:$0xff]   ;;  %1694 = vmatpush1.bf16.msra.mxu0 %v2361_v3 }
  0x28   :  { %43 = vst [vmem:[#allocation2 + $0x18] sm:$0xff] %v2795_v0  ;;  %44 = vst [vmem:[#allocation2 + $0x20] sm:$0xff] %v2795_v0  ;;  %1866 = vmatpush1.bf16.msra.mxu1 %v2362_v4  ;;  %v2365_v6 = vld [vmem:[#allocation5 + $0x2c] ss:$16 sps:$4 sm:$0xff]   ;;  %v2367_v7 = vld [vmem:[#allocation5 + $0x20] ss:$16 sps:$4 sm:$0xff]   ;;  %1695 = vmatprep.subr.bf16.mxu0 %v2363_v5 }
  0x29   :  { %45 = vst [vmem:[#allocation2 + $0x28] sm:$0xff] %v2795_v0  ;;  %46 = vst [vmem:[#allocation2 + $0x30] sm:$0xff] %v2795_v0  ;;  %v2368_v8 = vld [vmem:[#allocation5 + $0x28] ss:$16 sps:$4 sm:$0xff]   ;;  %1867 = vmatprep.subr.bf16.mxu1 %v2365_v6  ;;  %v2369_v9 = vld [vmem:[#allocation5 + $0x44] ss:$16 sps:$4 sm:$0xff]  }
  0x2a   :  { %47 = vst [vmem:[#allocation2 + $0x38] sm:$0xff] %v2795_v0  ;;  %v2371_v10 = vld [vmem:[#allocation5 + $0x4c] ss:$16 sps:$4 sm:$0xff]   ;;  %v2373_v11 = vld [vmem:[#allocation5 + $0x40] ss:$16 sps:$4 sm:$0xff]   ;;  %v2857_v44 = vshrl.u32 %v64_v39, 7 }
  0x2b   :  { %v2374_v12 = vld [vmem:[#allocation5 + $0x48] ss:$16 sps:$4 sm:$0xff]   ;;  %1696 = vmatpush1.bf16.msra.mxu0 %v2367_v7  ;;  %v2375_v13 = vld [vmem:[#allocation5 + $0x64] ss:$16 sps:$4 sm:$0xff]   ;;  %v2377_v14 = vld [vmem:[#allocation5 + $0x6c] ss:$16 sps:$4 sm:$0xff]  }
  0x2c   :  { %1868 = vmatpush1.bf16.msra.mxu1 %v2368_v8  ;;  %1697 = vmatprep.subr.bf16.mxu0 %v2369_v9  ;;  %v2379_v15 = vld [vmem:[#allocation5 + $0x60] ss:$16 sps:$4 sm:$0xff]   ;;  %v2380_v16 = vld [vmem:[#allocation5 + $0x68] ss:$16 sps:$4 sm:$0xff]   ;;  %v2381_v17 = vld [vmem:[#allocation5 + $0x84] ss:$16 sps:$4 sm:$0xff]  }
  0x2d   :  { %1869 = vmatprep.subr.bf16.mxu1 %v2371_v10  ;;  %v2383_v18 = vld [vmem:[#allocation5 + $0x8c] ss:$16 sps:$4 sm:$0xff]   ;;  %v2385_v19 = vld [vmem:[#allocation5 + $0x80] ss:$16 sps:$4 sm:$0xff]   ;;  %v2386_v20 = vld [vmem:[#allocation5 + $0x88] ss:$16 sps:$4 sm:$0xff]  }
  0x2e   :  { %v2387_v21 = vld [vmem:[#allocation5 + $0xa4] ss:$16 sps:$4 sm:$0xff]   ;;  %v2389_v22 = vld [vmem:[#allocation5 + $0xac] ss:$16 sps:$4 sm:$0xff]   ;;  %v2391_v23 = vld [vmem:[#allocation5 + $0xa0] ss:$16 sps:$4 sm:$0xff]  }
  0x2f   :  { %1698 = vmatpush1.bf16.msra.mxu0 %v2373_v11  ;;  %v2392_v24 = vld [vmem:[#allocation5 + $0xa8] ss:$16 sps:$4 sm:$0xff]   ;;  %v2393_v25 = vld [vmem:[#allocation5 + $0xc4] ss:$16 sps:$4 sm:$0xff]   ;;  %v2395_v26 = vld [vmem:[#allocation5 + $0xcc] ss:$16 sps:$4 sm:$0xff]  }
  0x30   :  { %1870 = vmatpush1.bf16.msra.mxu1 %v2374_v12  ;;  %1699 = vmatprep.subr.bf16.mxu0 %v2375_v13  ;;  %v2397_v27 = vld [vmem:[#allocation5 + $0xc0] ss:$16 sps:$4 sm:$0xff]   ;;  %v2398_v28 = vld [vmem:[#allocation5 + $0xc8] ss:$16 sps:$4 sm:$0xff]   ;;  %v2399_v29 = vld [vmem:[#allocation5 + $0xe4] ss:$16 sps:$4 sm:$0xff]  }
  0x31   :  { %1871 = vmatprep.subr.bf16.mxu1 %v2377_v14  ;;  %v2401_v30 = vld [vmem:[#allocation5 + $0xec] ss:$16 sps:$4 sm:$0xff]   ;;  %v2403_v31 = vld [vmem:[#allocation5 + $0xe0] ss:$16 sps:$4 sm:$0xff]   ;;  %v2404_v32 = vld [vmem:[#allocation5 + $0xe8] ss:$16 sps:$4 sm:$0xff]  }
  0x32   :  { %v2405_v33 = vld [vmem:[#allocation5 + $0x104] ss:$16 sps:$4 sm:$0xff]   ;;  %v2407_v34 = vld [vmem:[#allocation5 + $0x10c] ss:$16 sps:$4 sm:$0xff]   ;;  %v2409_v35 = vld [vmem:[#allocation5 + $0x100] ss:$16 sps:$4 sm:$0xff]  }
  0x33   :  { %1700 = vmatpush1.bf16.msra.mxu0 %v2379_v15  ;;  %v2410_v36 = vld [vmem:[#allocation5 + $0x108] ss:$16 sps:$4 sm:$0xff]   ;;  %v2796_v37 = vmov 1983009808   ;;  %v2411_v40 = vld [vmem:[#allocation5 + $0x124] ss:$16 sps:$4 sm:$0xff]  }
  0x34   :  { %1872 = vmatpush1.bf16.msra.mxu1 %v2380_v16  ;;  %1701 = vmatprep.subr.bf16.mxu0 %v2381_v17  ;;  %v62_v38 = vunpack.c.l.s4 %v2796_v37  ;;  %v2413_v41 = vld [vmem:[#allocation5 + $0x12c] ss:$16 sps:$4 sm:$0xff]   ;;  %v2415_v42 = vld [vmem:[#allocation5 + $0x120] ss:$16 sps:$4 sm:$0xff]   ;;  %v2416_v45 = vld [vmem:[#allocation5 + $0x128] ss:$16 sps:$4 sm:$0xff]  }
  0x35   :  { %1873 = vmatprep.subr.bf16.mxu1 %v2383_v18  ;;  %v2417_v46 = vld [vmem:[#allocation5 + $0x144] ss:$16 sps:$4 sm:$0xff]   ;;  %v2419_v47 = vld [vmem:[#allocation5 + $0x14c] ss:$16 sps:$4 sm:$0xff]   ;;  %v2421_v48 = vld [vmem:[#allocation5 + $0x140] ss:$16 sps:$4 sm:$0xff]  }
  0x36   :  { %v63_v43 = vunpack.c.0.s8 %v62_v38  ;;  %v2422_v49 = vld [vmem:[#allocation5 + $0x148] ss:$16 sps:$4 sm:$0xff]   ;;  %v2423_v51 = vld [vmem:[#allocation5 + $0x164] ss:$16 sps:$4 sm:$0xff]   ;;  %v2425_v52 = vld [vmem:[#allocation5 + $0x16c] ss:$16 sps:$4 sm:$0xff]  }
  0x37   :  { %1702 = vmatpush1.bf16.msra.mxu0 %v2385_v19  ;;  %v56_v53 = vld [vmem:[#allocation3] sm:$0xff]  ;;  %v2428_v57 = vld [vmem:[#allocation5 + $0x168] ss:$16 sps:$4 sm:$0xff]   ;;  %v2431_v59 = vld [vmem:[#allocation5 + $0x18c] ss:$16 sps:$4 sm:$0xff]  }
  0x38   :  { %1874 = vmatpush1.bf16.msra.mxu1 %v2386_v20  ;;  %1703 = vmatprep.subr.bf16.mxu0 %v2387_v21  ;;  %v2860_v50 = vsub.s32 %v63_v43, %v2857_v44  ;;  %v2427_v54 = vld [vmem:[#allocation5 + $0x160] ss:$16 sps:$4 sm:$0xff]   ;;  %2059 = vst.sshfl [vmem:[#allocation2] sm:$0x3 pattern:$0x76325410] %v56_v53  ;;  %v60_v56 = vcombine.high %v56_v53, %v56_v53 }
  0x39   :  { %1875 = vmatprep.subr.bf16.mxu1 %v2389_v22  ;;  %v2429_v58 = vld [vmem:[#allocation5 + $0x184] ss:$16 sps:$4 sm:$0xff]   ;;  %v2433_v62 = vld [vmem:[#allocation5 + $0x180] ss:$16 sps:$4 sm:$0xff]   ;;  %v2434_v1 = vld [vmem:[#allocation5 + $0x188] ss:$16 sps:$4 sm:$0xff]  }
  0x3a   :  { %v67_v55 = vrot.slane %v56_v53, %v2860_v50  ;;  %v74_v61 = vrot.slane %v60_v56, %v2860_v50  ;;  %2060 = vst.sshfl [vmem:[#allocation2 + $0x10] sm:$0x3 pattern:$0x76325410] %v60_v56  ;;  %v2435_v2 = vld [vmem:[#allocation5 + $0x1a4] ss:$16 sps:$4 sm:$0xff]  }
  0x3b   :  { %1704 = vmatpush1.bf16.msra.mxu0 %v2391_v23  ;;  %v2437_v3 = vld [vmem:[#allocation5 + $0x1ac] ss:$16 sps:$4 sm:$0xff]   ;;  %v2439_v4 = vld [vmem:[#allocation5 + $0x1a0] ss:$16 sps:$4 sm:$0xff]   ;;  %v2440_v5 = vld [vmem:[#allocation5 + $0x1a8] ss:$16 sps:$4 sm:$0xff]  }
  0x3c   :  { %1876 = vmatpush1.bf16.msra.mxu1 %v2392_v24  ;;  %1705 = vmatprep.subr.bf16.mxu0 %v2393_v25  ;;  %v75_v60 = vcombine.high %v67_v55, %v67_v55  ;;  %v76_v63 = vcombine.high %v74_v61, %v74_v61  ;;  %v2441_v6 = vld [vmem:[#allocation5 + $0x1c4] ss:$16 sps:$4 sm:$0xff]   ;;  %v2443_v7 = vld [vmem:[#allocation5 + $0x1cc] ss:$16 sps:$4 sm:$0xff]   ;;  %v2445_v9 = vld [vmem:[#allocation5 + $0x1c0] ss:$16 sps:$4 sm:$0xff]  }
  0x3d   :  { %1877 = vmatprep.subr.bf16.mxu1 %v2395_v26  ;;  %v2446_v11 = vld [vmem:[#allocation5 + $0x1c8] ss:$16 sps:$4 sm:$0xff]   ;;  %v2447_v12 = vld [vmem:[#allocation5 + $0x1e4] ss:$16 sps:$4 sm:$0xff]   ;;  %v2449_v13 = vld [vmem:[#allocation5 + $0x1ec] ss:$16 sps:$4 sm:$0xff]  }
  0x3e   :  { %103 = vst [vmem:[#allocation2 + $0x8] sm:$0x3] %v75_v60  ;;  %105 = vst [vmem:[#allocation2 + $0x18] sm:$0x3] %v76_v63  ;;  %v2451_v14 = vld [vmem:[#allocation5 + $0x1e0] ss:$16 sps:$4 sm:$0xff]  }
  0x3f   :  { %1706 = vmatpush1.bf16.msra.mxu0 %v2397_v27  ;;  %v2452_v15 = vld [vmem:[#allocation5 + $0x1e8] ss:$16 sps:$4 sm:$0xff]   ;;  %v2455_v16 = vld [vmem:[#allocation5 + $0x204] ss:$16 sps:$4 sm:$0xff]   ;;  %v2458_v18 = vld [vmem:[#allocation5 + $0x20c] ss:$16 sps:$4 sm:$0xff]  }
  0x40   :  { %1878 = vmatpush1.bf16.msra.mxu1 %v2398_v28  ;;  %1707 = vmatprep.subr.bf16.mxu0 %v2399_v29  ;;  %v111_v17 = vld [vmem:[#allocation2] sm:$0xff]  ;;  %v2456_v21 = vld [vmem:[#allocation5 + $0x208] ss:$16 sps:$4 sm:$0xff]   ;;  %v2464_v23 = vld [vmem:[#allocation5 + $0x22c] ss:$16 sps:$4 sm:$0xff]  }
  0x41   :  { %1879 = vmatprep.subr.bf16.mxu1 %v2401_v30  ;;  %v2453_v19 = vld [vmem:[#allocation5 + $0x200] ss:$16 sps:$4 sm:$0xff]   ;;  %v127_v20 = vpack.c.bf16 %v2795_v0, %v111_v17  ;;  %v2461_v22 = vld [vmem:[#allocation5 + $0x224] ss:$16 sps:$4 sm:$0xff]   ;;  %v2462_v25 = vld [vmem:[#allocation5 + $0x228] ss:$16 sps:$4 sm:$0xff]  }
  0x42   :  { %v2459_v24 = vld [vmem:[#allocation5 + $0x220] ss:$16 sps:$4 sm:$0xff]   ;;  %v2467_v26 = vld [vmem:[#allocation5 + $0x244] ss:$16 sps:$4 sm:$0xff]   ;;  %v2470_v27 = vld [vmem:[#allocation5 + $0x24c] ss:$16 sps:$4 sm:$0xff]  }
  0x43   :  { %1708 = vmatpush1.bf16.msra.mxu0 %v2403_v31  ;;  %v2465_v28 = vld [vmem:[#allocation5 + $0x240] ss:$16 sps:$4 sm:$0xff]   ;;  %v2468_v29 = vld [vmem:[#allocation5 + $0x248] ss:$16 sps:$4 sm:$0xff]   ;;  %v2473_v30 = vld [vmem:[#allocation5 + $0x264] ss:$16 sps:$4 sm:$0xff]  }
  0x44   :  { %1880 = vmatpush1.bf16.msra.mxu1 %v2404_v32  ;;  %1709 = vmatprep.subr.bf16.mxu0 %v2405_v33  ;;  %v2476_v31 = vld [vmem:[#allocation5 + $0x26c] ss:$16 sps:$4 sm:$0xff]   ;;  %v2471_v32 = vld [vmem:[#allocation5 + $0x260] ss:$16 sps:$4 sm:$0xff]   ;;  %v2474_v33 = vld [vmem:[#allocation5 + $0x268] ss:$16 sps:$4 sm:$0xff]  }
  0x45   :  { %1881 = vmatprep.subr.bf16.mxu1 %v2407_v34  ;;  %v112_v8 = vld [vmem:[#allocation2 + $0x8] sm:$0xff]  ;;  %v2479_v34 = vld [vmem:[#allocation5 + $0x284] ss:$16 sps:$4 sm:$0xff]   ;;  %v2501_v56 = vld [vmem:[#allocation5 + $0x300] ss:$16 sps:$4 sm:$0xff]  }
  0x46   :  { %v128_v10 = vpack.c.bf16 %v2795_v0, %v112_v8  ;;  %v2480_v37 = vld [vmem:[#allocation5 + $0x288] ss:$16 sps:$4 sm:$0xff]   ;;  %v2485_v38 = vld [vmem:[#allocation5 + $0x2a4] ss:$16 sps:$4 sm:$0xff]   ;;  %v2488_v39 = vld [vmem:[#allocation5 + $0x2ac] ss:$16 sps:$4 sm:$0xff]  }
  0x47   :  { %1710 = vmatpush1.bf16.msra.mxu0 %v2409_v35  ;;  %v2482_v35 = vld [vmem:[#allocation5 + $0x28c] ss:$16 sps:$4 sm:$0xff]   ;;  %v2498_v53 = vld [vmem:[#allocation5 + $0x2e8] ss:$16 sps:$4 sm:$0xff]   ;;  %v2507_v60 = vld [vmem:[#allocation5 + $0x320] ss:$16 sps:$4 sm:$0xff]  }
  0x48   :  { %1882 = vmatpush1.bf16.msra.mxu1 %v2410_v36  ;;  %1711 = vmatprep.subr.bf16.mxu0 %v2411_v40  ;;  %v2477_v36 = vld [vmem:[#allocation5 + $0x280] ss:$16 sps:$4 sm:$0xff]   ;;  %v2494_v43 = vld [vmem:[#allocation5 + $0x2cc] ss:$16 sps:$4 sm:$0xff]   ;;  %v2510_v61 = vld [vmem:[#allocation5 + $0x328] ss:$16 sps:$4 sm:$0xff]  }
  0x49   :  { %1883 = vmatprep.subr.bf16.mxu1 %v2413_v41  ;;  %1725 = vmatprep.mubr.bf16.mxu0 %v128_v10  ;;  %v2483_v40 = vld [vmem:[#allocation5 + $0x2a0] ss:$16 sps:$4 sm:$0xff]   ;;  %v2486_v41 = vld [vmem:[#allocation5 + $0x2a8] ss:$16 sps:$4 sm:$0xff]   ;;  %v2506_v55 = vld [vmem:[#allocation5 + $0x30c] ss:$16 sps:$4 sm:$0xff]  }
  0x4a   :  { %1897 = vmatprep.mubr.bf16.mxu1 %v128_v10  ;;  %v2518_v63 = vld [vmem:[#allocation5 + $0x34c] ss:$16 sps:$4 sm:$0xff]   ;;  %v2528_v10 = vld [vmem:[#allocation5 + $0x388] ss:$16 sps:$4 sm:$0xff]   ;;  %v2537_v17 = vld [vmem:[#allocation5 + $0x3c0] ss:$16 sps:$4 sm:$0xff]  }
  0x4b   :  { %1712 = vmatpush1.bf16.msra.mxu0 %v2415_v42  ;;  %v2491_v42 = vld [vmem:[#allocation5 + $0x2c4] ss:$16 sps:$4 sm:$0xff]   ;;  %v2530_v8 = vld [vmem:[#allocation5 + $0x38c] ss:$16 sps:$4 sm:$0xff]  }
  0x4c   :  { %1884 = vmatpush1.bf16.msra.mxu1 %v2416_v45  ;;  %1713 = vmatprep.subr.bf16.mxu0 %v2417_v46  ;;  %v114_v45 = vld [vmem:[#allocation2 + $0x18] sm:$0xff]  ;;  %v2489_v46 = vld [vmem:[#allocation5 + $0x2c0] ss:$16 sps:$4 sm:$0xff]  }
  0x4d   :  { %1885 = vmatprep.subr.bf16.mxu1 %v2419_v47  ;;  %v130_v47 = vpack.c.bf16 %v2795_v0, %v114_v45  ;;  %v2567_v45 = vld [vmem:[#allocation5 + $0x460] ss:$16 sps:$4 sm:$0xff]  }
  0x4f   :  { %1714 = vmatpush1.bf16.msra.mxu0 %v2421_v48  ;;  %v2492_v48 = vld [vmem:[#allocation5 + $0x2c8] ss:$16 sps:$4 sm:$0xff]  }
  0x50   :  { %1886 = vmatpush1.bf16.msra.mxu1 %v2422_v49  ;;  %1715 = vmatprep.subr.bf16.mxu0 %v2423_v51  ;;  %v2497_v49 = vld [vmem:[#allocation5 + $0x2e4] ss:$16 sps:$4 sm:$0xff]   ;;  %v2500_v51 = vld [vmem:[#allocation5 + $0x2ec] ss:$16 sps:$4 sm:$0xff]  }
  0x51   :  { %1887 = vmatprep.subr.bf16.mxu1 %v2425_v52  ;;  %v2495_v52 = vld [vmem:[#allocation5 + $0x2e0] ss:$16 sps:$4 sm:$0xff]  }
  0x53   :  { %1716 = vmatpush1.bf16.msra.mxu0 %v2427_v54  ;;  %v2503_v54 = vld [vmem:[#allocation5 + $0x304] ss:$16 sps:$4 sm:$0xff]  }
  0x54   :  { %1888 = vmatpush1.bf16.msra.mxu1 %v2428_v57  ;;  %1717 = vmatprep.subr.bf16.mxu0 %v2429_v58  ;;  %v2504_v57 = vld [vmem:[#allocation5 + $0x308] ss:$16 sps:$4 sm:$0xff]   ;;  %v2509_v58 = vld [vmem:[#allocation5 + $0x324] ss:$16 sps:$4 sm:$0xff]  }
  0x55   :  { %1889 = vmatprep.subr.bf16.mxu1 %v2431_v59  ;;  %v2512_v59 = vld [vmem:[#allocation5 + $0x32c] ss:$16 sps:$4 sm:$0xff]  }
  0x57   :  { %1718 = vmatpush1.bf16.msra.mxu0 %v2433_v62  ;;  %v2515_v62 = vld [vmem:[#allocation5 + $0x344] ss:$16 sps:$4 sm:$0xff]  }
  0x58   :  { %1890 = vmatpush1.bf16.msra.mxu1 %v2434_v1  ;;  %1719 = vmatprep.subr.bf16.mxu0 %v2435_v2  ;;  %v2513_v1 = vld [vmem:[#allocation5 + $0x340] ss:$16 sps:$4 sm:$0xff]   ;;  %v2516_v2 = vld [vmem:[#allocation5 + $0x348] ss:$16 sps:$4 sm:$0xff]  }
  0x59   :  { %1891 = vmatprep.subr.bf16.mxu1 %v2437_v3  ;;  %v2521_v3 = vld [vmem:[#allocation5 + $0x364] ss:$16 sps:$4 sm:$0xff]  }
  0x5b   :  { %1720 = vmatpush1.bf16.msra.mxu0 %v2439_v4  ;;  %v2524_v4 = vld [vmem:[#allocation5 + $0x36c] ss:$16 sps:$4 sm:$0xff]  }
  0x5c   :  { %1892 = vmatpush1.bf16.msra.mxu1 %v2440_v5  ;;  %1721 = vmatprep.subr.bf16.mxu0 %v2441_v6  ;;  %v2519_v5 = vld [vmem:[#allocation5 + $0x360] ss:$16 sps:$4 sm:$0xff]   ;;  %v2522_v6 = vld [vmem:[#allocation5 + $0x368] ss:$16 sps:$4 sm:$0xff]  }
  0x5d   :  { %1893 = vmatprep.subr.bf16.mxu1 %v2443_v7  ;;  %v2527_v7 = vld [vmem:[#allocation5 + $0x384] ss:$16 sps:$4 sm:$0xff]  }
  0x5f   :  { %1722 = vmatpush1.bf16.msra.mxu0 %v2445_v9  ;;  %v2525_v9 = vld [vmem:[#allocation5 + $0x380] ss:$16 sps:$4 sm:$0xff]  }
  0x60   :  { %1894 = vmatpush1.bf16.msra.mxu1 %v2446_v11  ;;  %1723 = vmatprep.subr.bf16.mxu0 %v2447_v12  ;;  %v2533_v11 = vld [vmem:[#allocation5 + $0x3a4] ss:$16 sps:$4 sm:$0xff]   ;;  %v2536_v12 = vld [vmem:[#allocation5 + $0x3ac] ss:$16 sps:$4 sm:$0xff]  }
  0x61   :  { %1895 = vmatprep.subr.bf16.mxu1 %v2449_v13  ;;  %v2531_v13 = vld [vmem:[#allocation5 + $0x3a0] ss:$16 sps:$4 sm:$0xff]  }
  0x63   :  { %1724 = vmatpush1.bf16.msra.mxu0 %v2451_v14  ;;  %v2534_v14 = vld [vmem:[#allocation5 + $0x3a8] ss:$16 sps:$4 sm:$0xff]  }
  0x64   :  { %1896 = vmatpush1.bf16.msra.mxu1 %v2452_v15  ;;  %1736 = vmatprep.subr.bf16.mxu0 %v2455_v16  ;;  %v2539_v15 = vld [vmem:[#allocation5 + $0x3c4] ss:$16 sps:$4 sm:$0xff]   ;;  %v2542_v16 = vld [vmem:[#allocation5 + $0x3cc] ss:$16 sps:$4 sm:$0xff]  }
  0x65   :  { %1908 = vmatprep.subr.bf16.mxu1 %v2458_v18  ;;  %v2540_v18 = vld [vmem:[#allocation5 + $0x3c8] ss:$16 sps:$4 sm:$0xff]  }
  0x66   :  { %1726 = vmatmul.mubr.bf16.vlgmr.msra.gmra.mrb[0].mxu0 %v127_v20 }
  0x67   :  { %1898 = vmatmul.mubr.bf16.vlgmr.msra.gmra.mrb[0].mxu1 %v127_v20  ;;  %1737 = vmatpush1.bf16.msra.mxu0 %v2453_v19  ;;  %v2545_v19 = vld [vmem:[#allocation5 + $0x3e4] ss:$16 sps:$4 sm:$0xff]   ;;  %v2548_v20 = vld [vmem:[#allocation5 + $0x3ec] ss:$16 sps:$4 sm:$0xff]  }
  0x68   :  { %1909 = vmatpush1.bf16.msra.mxu1 %v2456_v21  ;;  %1738 = vmatprep.subr.bf16.mxu0 %v2461_v22  ;;  %v2543_v21 = vld [vmem:[#allocation5 + $0x3e0] ss:$16 sps:$4 sm:$0xff]   ;;  %v2546_v22 = vld [vmem:[#allocation5 + $0x3e8] ss:$16 sps:$4 sm:$0xff]  }
  0x69   :  { %1910 = vmatprep.subr.bf16.mxu1 %v2464_v23  ;;  %1768 = vmatprep.mubr.bf16.mxu0 %v130_v47  ;;  %v113_v23 = vld [vmem:[#allocation2 + $0x10] sm:$0xff] }
  0x6a   :  { %1940 = vmatprep.mubr.bf16.mxu1 %v130_v47  ;;  %v2578_v47 = vld [vmem:[#allocation5 + $0x48c] ss:$16 sps:$4 sm:$0xff]  }
  0x6b   :  { %1739 = vmatpush1.bf16.msra.mxu0 %v2459_v24  ;;  %v2551_v24 = vld [vmem:[#allocation5 + $0x404] ss:$16 sps:$4 sm:$0xff]  }
  0x6c   :  { %1911 = vmatpush1.bf16.msra.mxu1 %v2462_v25  ;;  %1740 = vmatprep.subr.bf16.mxu0 %v2467_v26  ;;  %v2554_v25 = vld [vmem:[#allocation5 + $0x40c] ss:$16 sps:$4 sm:$0xff]   ;;  %v2549_v26 = vld [vmem:[#allocation5 + $0x400] ss:$16 sps:$4 sm:$0xff]  }
  0x6d   :  { %1912 = vmatprep.subr.bf16.mxu1 %v2470_v27  ;;  %v129_v27 = vpack.c.bf16 %v2795_v0, %v113_v23  ;;  %v2629_v23 = vld [vmem:[#allocation5 + $0x5a4] ss:$16 sps:$4 sm:$0xff]  }
  0x6f   :  { %1741 = vmatpush1.bf16.msra.mxu0 %v2465_v28  ;;  %v2552_v28 = vld [vmem:[#allocation5 + $0x408] ss:$16 sps:$4 sm:$0xff]  }
  0x70   :  { %1913 = vmatpush1.bf16.msra.mxu1 %v2468_v29  ;;  %1742 = vmatprep.subr.bf16.mxu0 %v2473_v30  ;;  %v2557_v29 = vld [vmem:[#allocation5 + $0x424] ss:$16 sps:$4 sm:$0xff]   ;;  %v2560_v30 = vld [vmem:[#allocation5 + $0x42c] ss:$16 sps:$4 sm:$0xff]  }
  0x71   :  { %1914 = vmatprep.subr.bf16.mxu1 %v2476_v31  ;;  %v57_v31 = vld [vmem:[#allocation3 + $0x8] sm:$0xff] }
  0x72   :  { %2061 = vst.sshfl [vmem:[#allocation2 + $0x20] sm:$0x3 pattern:$0x76325410] %v57_v31 }
  0x73   :  { %1743 = vmatpush1.bf16.msra.mxu0 %v2471_v32  ;;  %v77_v32 = vcombine.high %v57_v31, %v57_v31 }
  0x74   :  { %1915 = vmatpush1.bf16.msra.mxu1 %v2474_v33  ;;  %1744 = vmatprep.subr.bf16.mxu0 %v2479_v34  ;;  %v84_v33 = vrot.slane %v57_v31, %v2860_v50  ;;  %v2555_v34 = vld [vmem:[#allocation5 + $0x420] ss:$16 sps:$4 sm:$0xff]   ;;  %v2641_v31 = vld [vmem:[#allocation5 + $0x5e4] ss:$16 sps:$4 sm:$0xff]  }
  0x75   :  { %1916 = vmatprep.subr.bf16.mxu1 %v2482_v35  ;;  %v2558_v35 = vld [vmem:[#allocation5 + $0x428] ss:$16 sps:$4 sm:$0xff]   ;;  %2062 = vst.sshfl [vmem:[#allocation2 + $0x30] sm:$0x3 pattern:$0x76325410] %v77_v32  ;;  %v91_v0 = vrot.slane %v77_v32, %v2860_v50 }
  0x76   :  { %v2575_v50 = vld [vmem:[#allocation5 + $0x484] ss:$16 sps:$4 sm:$0xff]   ;;  %v2644_v32 = vld [vmem:[#allocation5 + $0x5ec] ss:$16 sps:$4 sm:$0xff]  }
  0x77   :  { %1745 = vmatpush1.bf16.msra.mxu0 %v2477_v36  ;;  %v92_v36 = vcombine.high %v84_v33, %v84_v33  ;;  %v2639_v33 = vld [vmem:[#allocation5 + $0x5e0] ss:$16 sps:$4 sm:$0xff]  }
  0x78   :  { %1917 = vmatpush1.bf16.msra.mxu1 %v2480_v37  ;;  %1746 = vmatprep.subr.bf16.mxu0 %v2485_v38  ;;  %v2563_v37 = vld [vmem:[#allocation5 + $0x444] ss:$16 sps:$4 sm:$0xff]   ;;  %v2566_v38 = vld [vmem:[#allocation5 + $0x44c] ss:$16 sps:$4 sm:$0xff]  }
  0x79   :  { %1918 = vmatprep.subr.bf16.mxu1 %v2488_v39  ;;  %107 = vst [vmem:[#allocation2 + $0x28] sm:$0x3] %v92_v36  ;;  %v93_v39 = vcombine.high %v91_v0, %v91_v0  ;;  %v2648_v36 = vld [vmem:[#allocation5 + $0x604] ss:$16 sps:$4 sm:$0xff]   ;;  %v2651_v0 = vld [vmem:[#allocation5 + $0x60c] ss:$16 sps:$4 sm:$0xff]  }
  0x7b   :  { %1747 = vmatpush1.bf16.msra.mxu0 %v2483_v40  ;;  %v2561_v40 = vld [vmem:[#allocation5 + $0x440] ss:$16 sps:$4 sm:$0xff]   ;;  %110 = vst.msk [vmem:[#allocation2 + $0x38] sm:$0x3] %vm109_vm0, %v93_v39 }
  0x7c   :  { %1919 = vmatpush1.bf16.msra.mxu1 %v2486_v41  ;;  %1748 = vmatprep.subr.bf16.mxu0 %v2491_v42  ;;  %v2564_v41 = vld [vmem:[#allocation5 + $0x448] ss:$16 sps:$4 sm:$0xff]   ;;  %v2569_v42 = vld [vmem:[#allocation5 + $0x464] ss:$16 sps:$4 sm:$0xff]   ;;  %v2646_v39 = vld [vmem:[#allocation5 + $0x600] ss:$16 sps:$4 sm:$0xff]  }
  0x7d   :  { %1920 = vmatprep.subr.bf16.mxu1 %v2494_v43  ;;  %v2572_v43 = vld [vmem:[#allocation5 + $0x46c] ss:$16 sps:$4 sm:$0xff]  }
  0x7f   :  { %1749 = vmatpush1.bf16.msra.mxu0 %v2489_v46  ;;  %v2570_v46 = vld [vmem:[#allocation5 + $0x468] ss:$16 sps:$4 sm:$0xff]  }
  0x80   :  { %1921 = vmatpush1.bf16.msra.mxu1 %v2492_v48  ;;  %1750 = vmatprep.subr.bf16.mxu0 %v2497_v49  ;;  %v116_v48 = vld [vmem:[#allocation2 + $0x28] sm:$0xff] }
  0x81   :  { %1922 = vmatprep.subr.bf16.mxu1 %v2500_v51  ;;  %v2870_v49 = vld [vmem:[#allocation2 + $0x48] sm:$0xff] }
  0x82   :  { %v132_v51 = vpack.c.bf16 %v2870_v49, %v116_v48  ;;  %v2658_v48 = vld [vmem:[#allocation5 + $0x640] ss:$16 sps:$4 sm:$0xff]  }
  0x83   :  { %1751 = vmatpush1.bf16.msra.mxu0 %v2495_v52  ;;  %v2573_v52 = vld [vmem:[#allocation5 + $0x480] ss:$16 sps:$4 sm:$0xff]  }
  0x84   :  { %1923 = vmatpush1.bf16.msra.mxu1 %v2498_v53  ;;  %1752 = vmatprep.subr.bf16.mxu0 %v2503_v54  ;;  %v2576_v53 = vld [vmem:[#allocation5 + $0x488] ss:$16 sps:$4 sm:$0xff]   ;;  %v2581_v54 = vld [vmem:[#allocation5 + $0x4a4] ss:$16 sps:$4 sm:$0xff]  }
  0x85   :  { %1924 = vmatprep.subr.bf16.mxu1 %v2506_v55  ;;  %v2584_v55 = vld [vmem:[#allocation5 + $0x4ac] ss:$16 sps:$4 sm:$0xff]  }
  0x87   :  { %1753 = vmatpush1.bf16.msra.mxu0 %v2501_v56  ;;  %v2579_v56 = vld [vmem:[#allocation5 + $0x4a0] ss:$16 sps:$4 sm:$0xff]  }
  0x88   :  { %1925 = vmatpush1.bf16.msra.mxu1 %v2504_v57  ;;  %1754 = vmatprep.subr.bf16.mxu0 %v2509_v58  ;;  %v2582_v57 = vld [vmem:[#allocation5 + $0x4a8] ss:$16 sps:$4 sm:$0xff]   ;;  %v2587_v58 = vld [vmem:[#allocation5 + $0x4c4] ss:$16 sps:$4 sm:$0xff]  }
  0x89   :  { %1926 = vmatprep.subr.bf16.mxu1 %v2512_v59  ;;  %v2590_v59 = vld [vmem:[#allocation5 + $0x4cc] ss:$16 sps:$4 sm:$0xff]  }
  0x8b   :  { %1755 = vmatpush1.bf16.msra.mxu0 %v2507_v60  ;;  %v2585_v60 = vld [vmem:[#allocation5 + $0x4c0] ss:$16 sps:$4 sm:$0xff]  }
  0x8c   :  { %1927 = vmatpush1.bf16.msra.mxu1 %v2510_v61  ;;  %1756 = vmatprep.subr.bf16.mxu0 %v2515_v62  ;;  %v2588_v61 = vld [vmem:[#allocation5 + $0x4c8] ss:$16 sps:$4 sm:$0xff]   ;;  %v2593_v62 = vld [vmem:[#allocation5 + $0x4e4] ss:$16 sps:$4 sm:$0xff]  }
  0x8d   :  { %1928 = vmatprep.subr.bf16.mxu1 %v2518_v63  ;;  %v2596_v63 = vld [vmem:[#allocation5 + $0x4ec] ss:$16 sps:$4 sm:$0xff]  }
  0x8f   :  { %1757 = vmatpush1.bf16.msra.mxu0 %v2513_v1  ;;  %v2591_v1 = vld [vmem:[#allocation5 + $0x4e0] ss:$16 sps:$4 sm:$0xff]  }
  0x90   :  { %1929 = vmatpush1.bf16.msra.mxu1 %v2516_v2  ;;  %1758 = vmatprep.subr.bf16.mxu0 %v2521_v3  ;;  %v2594_v2 = vld [vmem:[#allocation5 + $0x4e8] ss:$16 sps:$4 sm:$0xff]   ;;  %v2599_v3 = vld [vmem:[#allocation5 + $0x504] ss:$16 sps:$4 sm:$0xff]  }
  0x91   :  { %1930 = vmatprep.subr.bf16.mxu1 %v2524_v4  ;;  %v2602_v4 = vld [vmem:[#allocation5 + $0x50c] ss:$16 sps:$4 sm:$0xff]  }
  0x93   :  { %1759 = vmatpush1.bf16.msra.mxu0 %v2519_v5  ;;  %v2597_v5 = vld [vmem:[#allocation5 + $0x500] ss:$16 sps:$4 sm:$0xff]  }
  0x94   :  { %1931 = vmatpush1.bf16.msra.mxu1 %v2522_v6  ;;  %1760 = vmatprep.subr.bf16.mxu0 %v2527_v7  ;;  %v2600_v6 = vld [vmem:[#allocation5 + $0x508] ss:$16 sps:$4 sm:$0xff]   ;;  %v2605_v7 = vld [vmem:[#allocation5 + $0x524] ss:$16 sps:$4 sm:$0xff]  }
  0x95   :  { %1932 = vmatprep.subr.bf16.mxu1 %v2530_v8  ;;  %v2608_v8 = vld [vmem:[#allocation5 + $0x52c] ss:$16 sps:$4 sm:$0xff]  }
  0x97   :  { %1761 = vmatpush1.bf16.msra.mxu0 %v2525_v9  ;;  %v2603_v9 = vld [vmem:[#allocation5 + $0x520] ss:$16 sps:$4 sm:$0xff]  }
  0x98   :  { %1933 = vmatpush1.bf16.msra.mxu1 %v2528_v10  ;;  %1762 = vmatprep.subr.bf16.mxu0 %v2533_v11  ;;  %v2606_v10 = vld [vmem:[#allocation5 + $0x528] ss:$16 sps:$4 sm:$0xff]   ;;  %v2611_v11 = vld [vmem:[#allocation5 + $0x544] ss:$16 sps:$4 sm:$0xff]  }
  0x99   :  { %1934 = vmatprep.subr.bf16.mxu1 %v2536_v12  ;;  %v2614_v12 = vld [vmem:[#allocation5 + $0x54c] ss:$16 sps:$4 sm:$0xff]  }
  0x9b   :  { %1763 = vmatpush1.bf16.msra.mxu0 %v2531_v13  ;;  %v2609_v13 = vld [vmem:[#allocation5 + $0x540] ss:$16 sps:$4 sm:$0xff]  }
  0x9c   :  { %1935 = vmatpush1.bf16.msra.mxu1 %v2534_v14  ;;  %1764 = vmatprep.subr.bf16.mxu0 %v2539_v15  ;;  %v2612_v14 = vld [vmem:[#allocation5 + $0x548] ss:$16 sps:$4 sm:$0xff]   ;;  %v2617_v15 = vld [vmem:[#allocation5 + $0x564] ss:$16 sps:$4 sm:$0xff]  }
  0x9d   :  { %1936 = vmatprep.subr.bf16.mxu1 %v2542_v16  ;;  %v2620_v16 = vld [vmem:[#allocation5 + $0x56c] ss:$16 sps:$4 sm:$0xff]  }
  0x9f   :  { %1765 = vmatpush1.bf16.msra.mxu0 %v2537_v17  ;;  %v2615_v17 = vld [vmem:[#allocation5 + $0x560] ss:$16 sps:$4 sm:$0xff]  }
  0xa0   :  { %1937 = vmatpush1.bf16.msra.mxu1 %v2540_v18  ;;  %1766 = vmatprep.subr.bf16.mxu0 %v2545_v19  ;;  %v2618_v18 = vld [vmem:[#allocation5 + $0x568] ss:$16 sps:$4 sm:$0xff]   ;;  %v2623_v19 = vld [vmem:[#allocation5 + $0x584] ss:$16 sps:$4 sm:$0xff]  }
  0xa1   :  { %1938 = vmatprep.subr.bf16.mxu1 %v2548_v20  ;;  %v2626_v20 = vld [vmem:[#allocation5 + $0x58c] ss:$16 sps:$4 sm:$0xff]  }
  0xa3   :  { %1767 = vmatpush1.bf16.msra.mxu0 %v2543_v21  ;;  %v2621_v21 = vld [vmem:[#allocation5 + $0x580] ss:$16 sps:$4 sm:$0xff]  }
  0xa4   :  { %1939 = vmatpush1.bf16.msra.mxu1 %v2546_v22  ;;  %1779 = vmatprep.subr.bf16.mxu0 %v2551_v24  ;;  %v2624_v22 = vld [vmem:[#allocation5 + $0x588] ss:$16 sps:$4 sm:$0xff]   ;;  %v2632_v24 = vld [vmem:[#allocation5 + $0x5ac] ss:$16 sps:$4 sm:$0xff]  }
  0xa5   :  { %1951 = vmatprep.subr.bf16.mxu1 %v2554_v25  ;;  %v2627_v25 = vld [vmem:[#allocation5 + $0x5a0] ss:$16 sps:$4 sm:$0xff]  }
  0xa6   :  { %1769 = vmatmul.mubr.bf16.vlgmr.msra.gmra.mrb[0].mxu0 %v129_v27 }
  0xa7   :  { %1941 = vmatmul.mubr.bf16.vlgmr.msra.gmra.mrb[0].mxu1 %v129_v27  ;;  %1780 = vmatpush1.bf16.msra.mxu0 %v2549_v26  ;;  %v2630_v26 = vld [vmem:[#allocation5 + $0x5a8] ss:$16 sps:$4 sm:$0xff]   ;;  %v2635_v27 = vld [vmem:[#allocation5 + $0x5c4] ss:$16 sps:$4 sm:$0xff]  }
  0xa8   :  { %1952 = vmatpush1.bf16.msra.mxu1 %v2552_v28  ;;  %1781 = vmatprep.subr.bf16.mxu0 %v2557_v29  ;;  %v2638_v28 = vld [vmem:[#allocation5 + $0x5cc] ss:$16 sps:$4 sm:$0xff]   ;;  %v2633_v29 = vld [vmem:[#allocation5 + $0x5c0] ss:$16 sps:$4 sm:$0xff]  }
  0xa9   :  { %1953 = vmatprep.subr.bf16.mxu1 %v2560_v30  ;;  %1811 = vmatprep.mubr.bf16.mxu0 %v132_v51  ;;  %v2636_v30 = vld [vmem:[#allocation5 + $0x5c8] ss:$16 sps:$4 sm:$0xff]  }
  0xaa   :  { %1983 = vmatprep.mubr.bf16.mxu1 %v132_v51  ;;  %v2661_v51 = vld [vmem:[#allocation5 + $0x648] ss:$16 sps:$4 sm:$0xff]  }
  0xab   :  { %1782 = vmatpush1.bf16.msra.mxu0 %v2555_v34  ;;  %v2642_v34 = vld [vmem:[#allocation5 + $0x5e8] ss:$16 sps:$4 sm:$0xff]  }
  0xac   :  { %1954 = vmatpush1.bf16.msra.mxu1 %v2558_v35  ;;  %1783 = vmatprep.subr.bf16.mxu0 %v2563_v37  ;;  %v115_v35 = vld [vmem:[#allocation2 + $0x20] sm:$0xff] }
  0xad   :  { %1955 = vmatprep.subr.bf16.mxu1 %v2566_v38  ;;  %v131_v37 = vpack.c.bf16 %v2870_v49, %v115_v35  ;;  %v118_v38 = vld [vmem:[#allocation2 + $0x38] sm:$0xff]  ;;  %v2730_v35 = vld [vmem:[#allocation5 + $0x7c0] ss:$16 sps:$4 sm:$0xff]  }
  0xaf   :  { %1784 = vmatpush1.bf16.msra.mxu0 %v2561_v40  ;;  %v2649_v40 = vld [vmem:[#allocation5 + $0x608] ss:$16 sps:$4 sm:$0xff]  }
  0xb0   :  { %1956 = vmatpush1.bf16.msra.mxu1 %v2564_v41  ;;  %1785 = vmatprep.subr.bf16.mxu0 %v2569_v42  ;;  %v2654_v41 = vld [vmem:[#allocation5 + $0x624] ss:$16 sps:$4 sm:$0xff]   ;;  %v2657_v42 = vld [vmem:[#allocation5 + $0x62c] ss:$16 sps:$4 sm:$0xff]  }
  0xb1   :  { %1957 = vmatprep.subr.bf16.mxu1 %v2572_v43  ;;  %v134_v43 = vpack.c.bf16 %v2870_v49, %v118_v38  ;;  %v2736_v38 = vld [vmem:[#allocation5 + $0x7e0] ss:$16 sps:$4 sm:$0xff]  }
  0xb3   :  { %1786 = vmatpush1.bf16.msra.mxu0 %v2567_v45  ;;  %v2652_v45 = vld [vmem:[#allocation5 + $0x620] ss:$16 sps:$4 sm:$0xff]  }
  0xb4   :  { %1958 = vmatpush1.bf16.msra.mxu1 %v2570_v46  ;;  %1787 = vmatprep.subr.bf16.mxu0 %v2575_v50  ;;  %v2655_v46 = vld [vmem:[#allocation5 + $0x628] ss:$16 sps:$4 sm:$0xff]   ;;  %v2660_v50 = vld [vmem:[#allocation5 + $0x644] ss:$16 sps:$4 sm:$0xff]  }
  0xb5   :  { %1959 = vmatprep.subr.bf16.mxu1 %v2578_v47  ;;  %v2663_v47 = vld [vmem:[#allocation5 + $0x64c] ss:$16 sps:$4 sm:$0xff]  }
  0xb7   :  { %1788 = vmatpush1.bf16.msra.mxu0 %v2573_v52  ;;  %v2666_v52 = vld [vmem:[#allocation5 + $0x664] ss:$16 sps:$4 sm:$0xff]  }
  0xb8   :  { %1960 = vmatpush1.bf16.msra.mxu1 %v2576_v53  ;;  %1789 = vmatprep.subr.bf16.mxu0 %v2581_v54  ;;  %v2669_v53 = vld [vmem:[#allocation5 + $0x66c] ss:$16 sps:$4 sm:$0xff]   ;;  %v2664_v54 = vld [vmem:[#allocation5 + $0x660] ss:$16 sps:$4 sm:$0xff]  }
  0xb9   :  { %1961 = vmatprep.subr.bf16.mxu1 %v2584_v55  ;;  %v2667_v55 = vld [vmem:[#allocation5 + $0x668] ss:$16 sps:$4 sm:$0xff]  }
  0xbb   :  { %1790 = vmatpush1.bf16.msra.mxu0 %v2579_v56  ;;  %v2672_v56 = vld [vmem:[#allocation5 + $0x684] ss:$16 sps:$4 sm:$0xff]  }
  0xbc   :  { %1962 = vmatpush1.bf16.msra.mxu1 %v2582_v57  ;;  %1791 = vmatprep.subr.bf16.mxu0 %v2587_v58  ;;  %v2675_v57 = vld [vmem:[#allocation5 + $0x68c] ss:$16 sps:$4 sm:$0xff]   ;;  %v2670_v58 = vld [vmem:[#allocation5 + $0x680] ss:$16 sps:$4 sm:$0xff]  }
  0xbd   :  { %1963 = vmatprep.subr.bf16.mxu1 %v2590_v59  ;;  %v2673_v59 = vld [vmem:[#allocation5 + $0x688] ss:$16 sps:$4 sm:$0xff]  }
  0xbf   :  { %1792 = vmatpush1.bf16.msra.mxu0 %v2585_v60  ;;  %v2678_v60 = vld [vmem:[#allocation5 + $0x6a4] ss:$16 sps:$4 sm:$0xff]  }
  0xc0   :  { %1964 = vmatpush1.bf16.msra.mxu1 %v2588_v61  ;;  %1793 = vmatprep.subr.bf16.mxu0 %v2593_v62  ;;  %v2681_v61 = vld [vmem:[#allocation5 + $0x6ac] ss:$16 sps:$4 sm:$0xff]   ;;  %v2676_v62 = vld [vmem:[#allocation5 + $0x6a0] ss:$16 sps:$4 sm:$0xff]  }
  0xc1   :  { %1965 = vmatprep.subr.bf16.mxu1 %v2596_v63  ;;  %v2679_v63 = vld [vmem:[#allocation5 + $0x6a8] ss:$16 sps:$4 sm:$0xff]  }
  0xc3   :  { %1794 = vmatpush1.bf16.msra.mxu0 %v2591_v1  ;;  %v2684_v1 = vld [vmem:[#allocation5 + $0x6c4] ss:$16 sps:$4 sm:$0xff]  }
  0xc4   :  { %1966 = vmatpush1.bf16.msra.mxu1 %v2594_v2  ;;  %1795 = vmatprep.subr.bf16.mxu0 %v2599_v3  ;;  %v2687_v2 = vld [vmem:[#allocation5 + $0x6cc] ss:$16 sps:$4 sm:$0xff]   ;;  %v2682_v3 = vld [vmem:[#allocation5 + $0x6c0] ss:$16 sps:$4 sm:$0xff]  }
  0xc5   :  { %1967 = vmatprep.subr.bf16.mxu1 %v2602_v4  ;;  %v2685_v4 = vld [vmem:[#allocation5 + $0x6c8] ss:$16 sps:$4 sm:$0xff]  }
  0xc7   :  { %1796 = vmatpush1.bf16.msra.mxu0 %v2597_v5  ;;  %v2690_v5 = vld [vmem:[#allocation5 + $0x6e4] ss:$16 sps:$4 sm:$0xff]  }
  0xc8   :  { %1968 = vmatpush1.bf16.msra.mxu1 %v2600_v6  ;;  %1797 = vmatprep.subr.bf16.mxu0 %v2605_v7  ;;  %v2693_v6 = vld [vmem:[#allocation5 + $0x6ec] ss:$16 sps:$4 sm:$0xff]   ;;  %v2688_v7 = vld [vmem:[#allocation5 + $0x6e0] ss:$16 sps:$4 sm:$0xff]  }
  0xc9   :  { %1969 = vmatprep.subr.bf16.mxu1 %v2608_v8  ;;  %v2691_v8 = vld [vmem:[#allocation5 + $0x6e8] ss:$16 sps:$4 sm:$0xff]  }
  0xcb   :  { %1798 = vmatpush1.bf16.msra.mxu0 %v2603_v9  ;;  %v2696_v9 = vld [vmem:[#allocation5 + $0x704] ss:$16 sps:$4 sm:$0xff]  }
  0xcc   :  { %1970 = vmatpush1.bf16.msra.mxu1 %v2606_v10  ;;  %1799 = vmatprep.subr.bf16.mxu0 %v2611_v11  ;;  %v2699_v10 = vld [vmem:[#allocation5 + $0x70c] ss:$16 sps:$4 sm:$0xff]   ;;  %v2694_v11 = vld [vmem:[#allocation5 + $0x700] ss:$16 sps:$4 sm:$0xff]  }
  0xcd   :  { %1971 = vmatprep.subr.bf16.mxu1 %v2614_v12  ;;  %v2697_v12 = vld [vmem:[#allocation5 + $0x708] ss:$16 sps:$4 sm:$0xff]  }
  0xcf   :  { %1800 = vmatpush1.bf16.msra.mxu0 %v2609_v13  ;;  %v2702_v13 = vld [vmem:[#allocation5 + $0x724] ss:$16 sps:$4 sm:$0xff]  }
  0xd0   :  { %1972 = vmatpush1.bf16.msra.mxu1 %v2612_v14  ;;  %1801 = vmatprep.subr.bf16.mxu0 %v2617_v15  ;;  %v2705_v14 = vld [vmem:[#allocation5 + $0x72c] ss:$16 sps:$4 sm:$0xff]   ;;  %v2700_v15 = vld [vmem:[#allocation5 + $0x720] ss:$16 sps:$4 sm:$0xff]  }
  0xd1   :  { %1973 = vmatprep.subr.bf16.mxu1 %v2620_v16  ;;  %v2703_v16 = vld [vmem:[#allocation5 + $0x728] ss:$16 sps:$4 sm:$0xff]  }
  0xd3   :  { %1802 = vmatpush1.bf16.msra.mxu0 %v2615_v17  ;;  %v2708_v17 = vld [vmem:[#allocation5 + $0x744] ss:$16 sps:$4 sm:$0xff]  }
  0xd4   :  { %1974 = vmatpush1.bf16.msra.mxu1 %v2618_v18  ;;  %1803 = vmatprep.subr.bf16.mxu0 %v2623_v19  ;;  %v2711_v18 = vld [vmem:[#allocation5 + $0x74c] ss:$16 sps:$4 sm:$0xff]   ;;  %v2706_v19 = vld [vmem:[#allocation5 + $0x740] ss:$16 sps:$4 sm:$0xff]  }
  0xd5   :  { %1975 = vmatprep.subr.bf16.mxu1 %v2626_v20  ;;  %v2709_v20 = vld [vmem:[#allocation5 + $0x748] ss:$16 sps:$4 sm:$0xff]  }
  0xd7   :  { %1804 = vmatpush1.bf16.msra.mxu0 %v2621_v21  ;;  %v2714_v21 = vld [vmem:[#allocation5 + $0x764] ss:$16 sps:$4 sm:$0xff]  }
  0xd8   :  { %1976 = vmatpush1.bf16.msra.mxu1 %v2624_v22  ;;  %1805 = vmatprep.subr.bf16.mxu0 %v2629_v23  ;;  %v2717_v22 = vld [vmem:[#allocation5 + $0x76c] ss:$16 sps:$4 sm:$0xff]   ;;  %v2712_v23 = vld [vmem:[#allocation5 + $0x760] ss:$16 sps:$4 sm:$0xff]  }
  0xd9   :  { %1977 = vmatprep.subr.bf16.mxu1 %v2632_v24  ;;  %v2715_v24 = vld [vmem:[#allocation5 + $0x768] ss:$16 sps:$4 sm:$0xff]  }
  0xdb   :  { %1806 = vmatpush1.bf16.msra.mxu0 %v2627_v25  ;;  %v2720_v25 = vld [vmem:[#allocation5 + $0x784] ss:$16 sps:$4 sm:$0xff]  }
  0xdc   :  { %1978 = vmatpush1.bf16.msra.mxu1 %v2630_v26  ;;  %1807 = vmatprep.subr.bf16.mxu0 %v2635_v27  ;;  %v2723_v26 = vld [vmem:[#allocation5 + $0x78c] ss:$16 sps:$4 sm:$0xff]   ;;  %v2718_v27 = vld [vmem:[#allocation5 + $0x780] ss:$16 sps:$4 sm:$0xff]  }
  0xdd   :  { %1979 = vmatprep.subr.bf16.mxu1 %v2638_v28  ;;  %v2721_v28 = vld [vmem:[#allocation5 + $0x788] ss:$16 sps:$4 sm:$0xff]  }
  0xdf   :  { %1808 = vmatpush1.bf16.msra.mxu0 %v2633_v29  ;;  %v2726_v29 = vld [vmem:[#allocation5 + $0x7a4] ss:$16 sps:$4 sm:$0xff]  }
  0xe0   :  { %1980 = vmatpush1.bf16.msra.mxu1 %v2636_v30  ;;  %1809 = vmatprep.subr.bf16.mxu0 %v2641_v31  ;;  %v2729_v30 = vld [vmem:[#allocation5 + $0x7ac] ss:$16 sps:$4 sm:$0xff]   ;;  %v2724_v31 = vld [vmem:[#allocation5 + $0x7a0] ss:$16 sps:$4 sm:$0xff]  }
  0xe1   :  { %1981 = vmatprep.subr.bf16.mxu1 %v2644_v32  ;;  %v2727_v32 = vld [vmem:[#allocation5 + $0x7a8] ss:$16 sps:$4 sm:$0xff]  }
  0xe3   :  { %1810 = vmatpush1.bf16.msra.mxu0 %v2639_v33  ;;  %v2732_v33 = vld [vmem:[#allocation5 + $0x7c4] ss:$16 sps:$4 sm:$0xff]  }
  0xe4   :  { %1982 = vmatpush1.bf16.msra.mxu1 %v2642_v34  ;;  %1822 = vmatprep.subr.bf16.mxu0 %v2648_v36  ;;  %v2735_v34 = vld [vmem:[#allocation5 + $0x7cc] ss:$16 sps:$4 sm:$0xff]   ;;  %v2733_v36 = vld [vmem:[#allocation5 + $0x7c8] ss:$16 sps:$4 sm:$0xff]  }
  0xe5   :  { %1994 = vmatprep.subr.bf16.mxu1 %v2651_v0  ;;  %v2738_v0 = vld [vmem:[#allocation5 + $0x7e4] ss:$16 sps:$4 sm:$0xff]  }
  0xe6   :  { %1812 = vmatmul.mubr.bf16.vlgmr.msra.gmra.mrb[0].mxu0 %v131_v37 }
  0xe7   :  { %1984 = vmatmul.mubr.bf16.vlgmr.msra.gmra.mrb[0].mxu1 %v131_v37  ;;  %1823 = vmatpush1.bf16.msra.mxu0 %v2646_v39  ;;  %v2741_v37 = vld [vmem:[#allocation5 + $0x7ec] ss:$16 sps:$4 sm:$0xff]   ;;  %v2739_v39 = vld [vmem:[#allocation5 + $0x7e8] ss:$16 sps:$4 sm:$0xff]  }
  0xe8   :  { %1995 = vmatpush1.bf16.msra.mxu1 %v2649_v40  ;;  %1824 = vmatprep.subr.bf16.mxu0 %v2654_v41  ;;  %v117_v40 = vld [vmem:[#allocation2 + $0x30] sm:$0xff] }
  0xe9   :  { %1996 = vmatprep.subr.bf16.mxu1 %v2657_v42  ;;  %1854 = vmatprep.mubr.bf16.mxu0 %v134_v43  ;;  %v133_v41 = vpack.c.bf16 %v2870_v49, %v117_v40  ;;  %v395_v42 = vsub.s32 0, %v2857_v44 }
  0xea   :  { %2026 = vmatprep.mubr.bf16.mxu1 %v134_v43  ;;  %v403_v43 = vsub.s32 2, %v2857_v44 }
  0xeb   :  { %1825 = vmatpush1.bf16.msra.mxu0 %v2652_v45  ;;  %v391_v45 = vld [vmem:[%s2909_s2] sm:$0xf] }
  0xec   :  { %1997 = vmatpush1.bf16.msra.mxu1 %v2655_v46  ;;  %1826 = vmatprep.subr.bf16.mxu0 %v2660_v50  ;;  %v399_v46 = vsub.s32 1, %v2857_v44  ;;  %v407_v50 = vsub.s32 3, %v2857_v44 }
  0xed   :  { %1998 = vmatprep.subr.bf16.mxu1 %v2663_v47  ;;  %v396_v47 = vrot.slane %v391_v45, %v395_v42 }
  0xee   :  { %v408_v49 = vrot.slane %v391_v45, %v407_v50 }
  0xef   :  { %1827 = vmatpush1.bf16.msra.mxu0 %v2658_v48  ;;  %v404_v48 = vrot.slane %v391_v45, %v403_v43 }
  0xf0   :  { %1999 = vmatpush1.bf16.msra.mxu1 %v2661_v51  ;;  %1828 = vmatprep.subr.bf16.mxu0 %v2666_v52  ;;  %v400_v51 = vrot.slane %v391_v45, %v399_v46 }
  0xf1   :  { %2000 = vmatprep.subr.bf16.mxu1 %v2669_v53 }
  0xf3   :  { %1829 = vmatpush1.bf16.msra.mxu0 %v2664_v54 }
  0xf4   :  { %2001 = vmatpush1.bf16.msra.mxu1 %v2667_v55  ;;  %1830 = vmatprep.subr.bf16.mxu0 %v2672_v56 }
  0xf5   :  { %2002 = vmatprep.subr.bf16.mxu1 %v2675_v57 }
  0xf7   :  { %1831 = vmatpush1.bf16.msra.mxu0 %v2670_v58 }
  0xf8   :  { %2003 = vmatpush1.bf16.msra.mxu1 %v2673_v59  ;;  %1832 = vmatprep.subr.bf16.mxu0 %v2678_v60 }
  0xf9   :  { %2004 = vmatprep.subr.bf16.mxu1 %v2681_v61 }
  0xfb   :  { %1833 = vmatpush1.bf16.msra.mxu0 %v2676_v62 }
  0xfc   :  { %2005 = vmatpush1.bf16.msra.mxu1 %v2679_v63  ;;  %1834 = vmatprep.subr.bf16.mxu0 %v2684_v1 }
  0xfd   :  { %2006 = vmatprep.subr.bf16.mxu1 %v2687_v2 }
  0xff   :  { %1835 = vmatpush1.bf16.msra.mxu0 %v2682_v3 }
 0x100   :  { %2007 = vmatpush1.bf16.msra.mxu1 %v2685_v4  ;;  %1836 = vmatprep.subr.bf16.mxu0 %v2690_v5 }
 0x101   :  { %2008 = vmatprep.subr.bf16.mxu1 %v2693_v6 }
 0x103   :  { %1837 = vmatpush1.bf16.msra.mxu0 %v2688_v7 }
 0x104   :  { %2009 = vmatpush1.bf16.msra.mxu1 %v2691_v8  ;;  %1838 = vmatprep.subr.bf16.mxu0 %v2696_v9 }
 0x105   :  { %2010 = vmatprep.subr.bf16.mxu1 %v2699_v10 }
 0x107   :  { %1839 = vmatpush1.bf16.msra.mxu0 %v2694_v11 }
 0x108   :  { %2011 = vmatpush1.bf16.msra.mxu1 %v2697_v12  ;;  %1840 = vmatprep.subr.bf16.mxu0 %v2702_v13 }
 0x109   :  { %2012 = vmatprep.subr.bf16.mxu1 %v2705_v14 }
 0x10b   :  { %1841 = vmatpush1.bf16.msra.mxu0 %v2700_v15 }
 0x10c   :  { %2013 = vmatpush1.bf16.msra.mxu1 %v2703_v16  ;;  %1842 = vmatprep.subr.bf16.mxu0 %v2708_v17 }
 0x10d   :  { %2014 = vmatprep.subr.bf16.mxu1 %v2711_v18 }
 0x10f   :  { %1843 = vmatpush1.bf16.msra.mxu0 %v2706_v19 }
 0x110   :  { %2015 = vmatpush1.bf16.msra.mxu1 %v2709_v20  ;;  %1844 = vmatprep.subr.bf16.mxu0 %v2714_v21 }
 0x111   :  { %2016 = vmatprep.subr.bf16.mxu1 %v2717_v22 }
 0x113   :  { %1845 = vmatpush1.bf16.msra.mxu0 %v2712_v23 }
 0x114   :  { %2017 = vmatpush1.bf16.msra.mxu1 %v2715_v24  ;;  %1846 = vmatprep.subr.bf16.mxu0 %v2720_v25 }
 0x115   :  { %2018 = vmatprep.subr.bf16.mxu1 %v2723_v26 }
 0x117   :  { %1847 = vmatpush1.bf16.msra.mxu0 %v2718_v27 }
 0x118   :  { %2019 = vmatpush1.bf16.msra.mxu1 %v2721_v28  ;;  %1848 = vmatprep.subr.bf16.mxu0 %v2726_v29 }
 0x119   :  { %2020 = vmatprep.subr.bf16.mxu1 %v2729_v30 }
 0x11b   :  { %1849 = vmatpush1.bf16.msra.mxu0 %v2724_v31 }
 0x11c   :  { %2021 = vmatpush1.bf16.msra.mxu1 %v2727_v32  ;;  %1850 = vmatprep.subr.bf16.mxu0 %v2732_v33 }
 0x11d   :  { %2022 = vmatprep.subr.bf16.mxu1 %v2735_v34 }
 0x11f   :  { %1851 = vmatpush1.bf16.msra.mxu0 %v2730_v35 }
 0x120   :  { %2023 = vmatpush1.bf16.msra.mxu1 %v2733_v36  ;;  %1852 = vmatprep.subr.bf16.mxu0 %v2738_v0 }
 0x121   :  { %2024 = vmatprep.subr.bf16.mxu1 %v2741_v37 }
 0x123   :  { %1853 = vmatpush1.bf16.msra.mxu0 %v2736_v38 }
 0x124   :  { %2025 = vmatpush1.bf16.msra.mxu1 %v2739_v39 }
 0x126   :  { %1855 = vmatmul.mubr.bf16.vlgmr.msra.gmra.mrb[0].mxu0 %v133_v41 }
 0x127   :  { %2027 = vmatmul.mubr.bf16.vlgmr.msra.gmra.mrb[0].mxu1 %v133_v41 }
 0x1f9   :  { %v1856_v52 = vpop.f32.mrb[0].mxu0 }
 0x1fa   :  { %v2028_v53 = vpop.f32.mrb[0].mxu1  ;;  %v2319_v54 = vadd.f32 %v1856_v52, %v396_v47  ;;  %v1858_v56 = vpop.f32.mrb[1].mxu0 }
 0x1fb   :  { %v2323_v55 = vadd.f32 %v2028_v53, %v404_v48  ;;  %v2030_v57 = vpop.f32.mrb[1].mxu1  ;;  %v2320_v58 = vadd.f32 %v1858_v56, %v400_v51  ;;  %v1860_v60 = vpop.f32.mrb[2].mxu0 }
 0x1fc   :  { %v2324_v59 = vadd.f32 %v2030_v57, %v408_v49  ;;  %v2032_v61 = vpop.f32.mrb[2].mxu1  ;;  %v2037_v62 = vmax.f32 %v2319_v54, 0.0  ;;  %v2321_v1 = vadd.f32 %v1860_v60, %v396_v47  ;;  %v1862_v3 = vpop.f32.mrb[3].mxu0 }
 0x1fd   :  { %v2039_v63 = vmax.f32 %v2323_v55, 0.0  ;;  %v2325_v2 = vadd.f32 %v2032_v61, %v404_v48  ;;  %v2034_v44 = vpop.f32.mrb[3].mxu1  ;;  %v2038_v4 = vmax.f32 %v2320_v58, 0.0  ;;  %v2322_v6 = vadd.f32 %v1862_v3, %v400_v51 }
 0x1fe   :  { %v2040_v5 = vmax.f32 %v2324_v59, 0.0  ;;  %v2326_v7 = vadd.f32 %v2034_v44, %v408_v49  ;;  %2045 = vst [vmem:[%s2910_s3] sm:$0xff] %v2037_v62  ;;  %v2041_v8 = vmax.f32 %v2321_v1, 0.0 }
 0x1ff   :  { %2047 = vst [vmem:[%s2910_s3 + $0x10] sm:$0xff] %v2039_v63  ;;  %v2043_v9 = vmax.f32 %v2325_v2, 0.0  ;;  %2046 = vst [vmem:[%s2910_s3 + $0x8] sm:$0xff] %v2038_v4  ;;  %v2042_v10 = vmax.f32 %v2322_v6, 0.0 }
 0x200   :  { %2048 = vst [vmem:[%s2910_s3 + $0x18] sm:$0xff] %v2040_v5  ;;  %v2044_v11 = vmax.f32 %v2326_v7, 0.0  ;;  %2049 = vst [vmem:[%s2910_s3 + $0x20] sm:$0xff] %v2041_v8 }
 0x201   :  { %2051 = vst [vmem:[%s2910_s3 + $0x30] sm:$0xff] %v2043_v9  ;;  %2050 = vst [vmem:[%s2910_s3 + $0x28] sm:$0xff] %v2042_v10 }
 0x202   :  { %2052 = vst [vmem:[%s2910_s3 + $0x38] sm:$0xff] %v2044_v11 }
 0x203   :  { %2057 = vsyncpa [#allocation4], 1 }
 0x204   :  { %2058 = vsyncpa [#allocation6], 1 }

</bundles_post_ra>
